<compile_context>
chip_gen: v5e
topology: v5e:2x2
jax: 0.10.0
libtpu: 0.0.40
codegen_flags: <defaults>
</compile_context>

<pallas_src>
import functools

import jax
import jax.numpy as jnp
from jax.experimental import pallas as pl
from jax.experimental.pallas import tpu as pltpu

EPS = 1e-5
NEG_SLOPE = 0.2
LANE = 128


def _leaky_relu(x):
    return jnp.where(x >= 0, x, NEG_SLOPE * x)


def _bn_train(h, gamma, beta, inv_b):
    """Training-mode BatchNorm1d (biased variance), two-pass for stability.

    A per-feature bias added to `h` shifts the mean identically and cancels,
    so fc biases feeding a BN are never materialized.
    """
    mean = jnp.sum(h, axis=0, keepdims=True) * inv_b
    d = h - mean
    var = jnp.sum(d * d, axis=0, keepdims=True) * inv_b
    scale = gamma * jax.lax.rsqrt(var + EPS)
    return d * scale + beta


def _resblock_kernel(has_fc3, final_nl, inv_b, tile_n,
                     xb_ref, w1_ref, g1_ref, be1_ref,
                     w2_ref, g2_ref, be2_ref, *rest):
    if has_fc3:
        w3_ref, b3_ref, o_ref, xin_ref = rest
    else:
        xf_ref, o_ref = rest

    k = pl.program_id(0)
    x_bf16 = xb_ref[...]

    @pl.when(k == 0)
    def _init():
        o_ref[...] = jnp.zeros_like(o_ref)
        if has_fc3:
            # Projection shortcut done up-front so it hides under the w1/w2
            # DMA stream instead of the last grid step's serial tail.
            xin = jnp.dot(x_bf16, w3_ref[...],
                          preferred_element_type=jnp.float32) + b3_ref[...]
            xin_ref[...] = _leaky_relu(xin)

    # fc1 tile (bias cancelled exactly by train-mode BN) -> BN1 -> LeakyReLU.
    if g1_ref.shape[1] == tile_n:            # single-step grid: static full read
        g1, be1 = g1_ref[...], be1_ref[...]
    else:                                    # kt > 1: aligned in-VMEM slice
        off = pl.multiple_of(k * tile_n, LANE)
        g1 = g1_ref[:, pl.ds(off, tile_n)]
        be1 = be1_ref[:, pl.ds(off, tile_n)]
    h = jnp.dot(x_bf16, w1_ref[...], preferred_element_type=jnp.float32)
    h = _leaky_relu(_bn_train(h, g1, be1, inv_b))

    # Partial fc2 (bias cancelled by BN2); accumulate straight into the
    # VMEM-resident output block (constant index_map across the grid).
    o_ref[...] += jnp.dot(h.astype(jnp.bfloat16), w2_ref[...],
                          preferred_element_type=jnp.float32)

    @pl.when(k == pl.num_programs(0) - 1)
    def _finalize():
        y = _bn_train(o_ref[...], g2_ref[...], be2_ref[...], inv_b)
        xin = xin_ref[...] if has_fc3 else xf_ref[...]
        out = xin + y
        if final_nl:
            out = _leaky_relu(out)
        o_ref[...] = out


def _round_up(n, m):
    return (n + m - 1) // m * m


def _pad2(a, rows, cols):
    pr, pc = rows - a.shape[0], cols - a.shape[1]
    if pr == 0 and pc == 0:
        return a
    return jnp.pad(a, ((0, pr), (0, pc)))


def _vmem_cap():
    cap = 48 << 20                       # safe below v7x's 64 MiB per-TC VMEM
    try:
        cap = max(cap, int(pltpu.get_tpu_info().vmem_capacity_bytes) * 3 // 4)
    except Exception:
        pass
    return cap


def _pinned_bytes(B, Fin_p, N_p, Fout_p, has_fc3):
    # Constant-index (single-buffered) blocks + the resident output block.
    pinned = (B * Fin_p * 2          # x (bf16)
              + 2 * N_p * 4          # gamma1, beta1
              + 2 * Fout_p * 4       # gamma2, beta2
              + B * Fout_p * 4)      # output / accumulator
    if has_fc3:
        pinned += Fin_p * Fout_p * 2 + Fout_p * 4 + B * Fout_p * 4  # w3, b3, xin scratch
    else:
        pinned += B * Fin_p * 4                                     # x (f32) identity path
    return pinned


def _choose_tile_n(B, Fin_p, N_p, Fout_p, has_fc3, budget):
    pinned = _pinned_bytes(B, Fin_p, N_p, Fout_p, has_fc3)
    t = N_p
    while t > LANE:
        if N_p % t == 0:
            streamed = 3 * t * (Fin_p + Fout_p) * 2    # w1 + w2 tiles, <=3-deep
            if pinned + streamed + 3 * B * t * 4 + (4 << 20) <= budget:
                return t
        t -= LANE
    return LANE


def resblock_forward(x, params, *, final_nl=True, tile_n=None):
    """x: [B, Fin] f32. params: dict from init_resblock_params. Returns [B, Fout] f32."""
    B, Fin = x.shape
    n_neurons = params["w1"].shape[1]
    Fout = params["w2"].shape[1]
    has_fc3 = Fin != Fout

    Fin_p = _round_up(Fin, LANE)
    N_p = _round_up(n_neurons, LANE)
    Fout_p = _round_up(Fout, LANE)
    # NOTE: 256-wide MXU tiles (v6e/v7x) only pay off once B is large enough to
    # be compute-bound; at small B the kernel is weight-DMA bound and 128-lane
    # rounding is right on every generation.

    cap = _vmem_cap()
    if tile_n is None:
        tile_n = _choose_tile_n(B, Fin_p, N_p, Fout_p, has_fc3, cap)
    assert N_p % tile_n == 0 and tile_n % LANE == 0
    kt = N_p // tile_n

    f32, bf16 = jnp.float32, jnp.bfloat16

    x_f32 = _pad2(x.astype(f32), B, Fin_p)
    x_bf16 = x_f32.astype(bf16)
    w1 = _pad2(params["w1"], Fin_p, N_p).astype(bf16)
    # One-time layout change so each streamed w1 tile is one contiguous DMA.
    w1 = w1.reshape(Fin_p, kt, tile_n).transpose(1, 0, 2)       # (kt, Fin_p, tile_n)
    g1 = _pad2(params["g1"], 1, N_p).astype(f32)
    be1 = _pad2(params["be1"], 1, N_p).astype(f32)
    w2 = _pad2(params["w2"], N_p, Fout_p).astype(bf16)
    g2 = _pad2(params["g2"], 1, Fout_p).astype(f32)
    be2 = _pad2(params["be2"], 1, Fout_p).astype(f32)

    stream_kw = dict(pipeline_mode=pl.Buffered(3)) if kt >= 4 else {}
    n_buf = 3 if kt >= 4 else 2

    args = [x_bf16, w1, g1, be1, w2, g2, be2]
    in_specs = [
        pl.BlockSpec((B, Fin_p), lambda k: (0, 0)),                            # x bf16 (pinned)
        pl.BlockSpec((None, Fin_p, tile_n), lambda k: (k, 0, 0), **stream_kw),  # w1 tile (streamed)
        pl.BlockSpec((1, N_p), lambda k: (0, 0)),                              # gamma1 (pinned)
        pl.BlockSpec((1, N_p), lambda k: (0, 0)),                              # beta1 (pinned)
        pl.BlockSpec((tile_n, Fout_p), lambda k: (k, 0), **stream_kw),         # w2 row tile (streamed)
        pl.BlockSpec((1, Fout_p), lambda k: (0, 0)),                           # gamma2 (pinned)
        pl.BlockSpec((1, Fout_p), lambda k: (0, 0)),                           # beta2 (pinned)
    ]
    scratch_shapes = []
    if has_fc3:
        w3 = _pad2(params["w3"], Fin_p, Fout_p).astype(bf16)
        b3 = _pad2(params["b3"], 1, Fout_p).astype(f32)
        args += [w3, b3]
        in_specs += [pl.BlockSpec((Fin_p, Fout_p), lambda k: (0, 0)),
                     pl.BlockSpec((1, Fout_p), lambda k: (0, 0))]
        scratch_shapes.append(pltpu.VMEM((B, Fout_p), f32))        # xin shortcut
    else:
        assert Fin_p == Fout_p
        args.append(x_f32)                                          # identity shortcut
        in_specs.append(pl.BlockSpec((B, Fin_p), lambda k: (0, 0)))

    pinned = _pinned_bytes(B, Fin_p, N_p, Fout_p, has_fc3)
    streamed = n_buf * tile_n * (Fin_p + Fout_p) * 2
    vmem_limit = int(min(cap, max(16 << 20,
                                  pinned + streamed + 3 * B * tile_n * 4 + (4 << 20))))

    # inv_b is baked as a Python float: B already appears in every block shape,
    # so a different batch size recompiles regardless.
    kernel = functools.partial(_resblock_kernel, has_fc3, final_nl, 1.0 / B, tile_n)
    out_p = pl.pallas_call(
        kernel,
        out_shape=jax.ShapeDtypeStruct((B, Fout_p), f32),
        grid_spec=pltpu.PrefetchScalarGridSpec(
            num_scalar_prefetch=0,
            grid=(kt,),
            in_specs=in_specs,
            out_specs=pl.BlockSpec((B, Fout_p), lambda k: (0, 0)),
            scratch_shapes=scratch_shapes,
        ),
        compiler_params=pltpu.CompilerParams(
            dimension_semantics=("arbitrary",),
            vmem_limit_bytes=vmem_limit,
        ),
    )(*args)
    return out_p[:, :Fout]


def init_resblock_params(key, Fin, Fout, n_neurons):
    """Deterministic synthetic parameters (Linear weights stored transposed: [in, out])."""
    ks = jax.random.split(key, 8)

    def lin(kw, kb, fin, fout):
        bound = 1.0 / jnp.sqrt(fin)
        w = jax.random.uniform(kw, (fin, fout), jnp.float32, -bound, bound)
        b = jax.random.uniform(kb, (1, fout), jnp.float32, -bound, bound)
        return w, b

    w1, b1 = lin(ks[0], ks[1], Fin, n_neurons)
    w2, b2 = lin(ks[2], ks[3], n_neurons, Fout)
    g1 = jnp.ones((1, n_neurons), jnp.float32) + 0.01 * jax.random.normal(ks[6], (1, n_neurons))
    be1 = jnp.zeros((1, n_neurons), jnp.float32)
    g2 = jnp.ones((1, Fout), jnp.float32) + 0.01 * jax.random.normal(ks[7], (1, Fout))
    be2 = jnp.zeros((1, Fout), jnp.float32)

    params = dict(w1=w1, b1=b1, g1=g1, be1=be1, w2=w2, b2=b2, g2=g2, be2=be2)
    if Fin != Fout:
        w3, b3 = lin(ks[4], ks[5], Fin, Fout)
        params.update(w3=w3, b3=b3)
    return params


def resblock_ref(x, params, *, final_nl=True, mxu_bf16=False):
    """Pure-JAX reference (training-mode BN). mxu_bf16=True mirrors the kernel's
    bf16 MXU-operand precision choice for a tight comparison."""
    def cast(a):
        return a.astype(jnp.bfloat16) if mxu_bf16 else a

    def mm(a, b):
        return jnp.dot(cast(a), cast(b), preferred_element_type=jnp.float32)

    def bn(h, g, b):
        m = h.mean(0, keepdims=True)
        v = ((h - m) ** 2).mean(0, keepdims=True)
        return (h - m) / jnp.sqrt(v + EPS) * g + b

    def lrelu(h):
        return jnp.where(h >= 0, h, NEG_SLOPE * h)

    Fin, Fout = x.shape[1], params["w2"].shape[1]
    if Fin == Fout:
        xin = x
    else:
        xin = lrelu(mm(x, params["w3"]) + params["b3"])
    h = lrelu(bn(mm(x, params["w1"]) + params["b1"], params["g1"], params["be1"]))
    y = bn(mm(h, params["w2"]) + params["b2"], params["g2"], params["be2"])
    out = xin + y
    return lrelu(out) if final_nl else out


if __name__ == "__main__":
    key = jax.random.PRNGKey(0)

    # Config 1: Fin != Fout (projection shortcut fc3).
    # Config 2: Fin == Fout (identity shortcut; no fc3 weights passed/DMA'd).
    # Default tile_n => full N per step: the grid collapses to a single step.
    configs = [
        dict(B=8, Fin=16, Fout=32, N=256, final_nl=True),
        dict(B=8, Fin=32, Fout=32, N=256, final_nl=False),
    ]
    for i, cfg in enumerate(configs):
        kx, kp, key = jax.random.split(key, 3)
        x = jax.random.normal(kx, (cfg["B"], cfg["Fin"]), jnp.float32)
        params = init_resblock_params(kp, cfg["Fin"], cfg["Fout"], cfg["N"])

        out = resblock_forward(x, params, final_nl=cfg["final_nl"])
        out = jax.block_until_ready(out)
        assert out.shape == (cfg["B"], cfg["Fout"])

        # Tight check vs a reference that mirrors the bf16 MXU-operand choice.
        ref_bf16 = resblock_ref(x, params, final_nl=cfg["final_nl"], mxu_bf16=True)
        assert jnp.allclose(out, ref_bf16, atol=1e-2, rtol=1e-2), f"cfg{i}: mismatch vs bf16 ref"

        # Looser sanity check vs exact f32 PyTorch-semantics math (bf16 MXU feeds
        # plus BN's 1/std amplification at B=8 set the achievable tolerance).
        ref_f32 = resblock_ref(x, params, final_nl=cfg["final_nl"], mxu_bf16=False)
        assert jnp.allclose(out, ref_f32, atol=1e-1, rtol=1e-1), f"cfg{i}: mismatch vs f32 ref"

    print("KERNEL_OK")
</pallas_src>

<mosaic_0001>
module attributes {stable_mosaic.version = 11 : i64} {
  func.func @_resblock_kernel(%arg0: i32, %arg1: memref<8x128xbf16, #tpu.memory_space<vmem>>, %arg2: memref<1x128x256xbf16, #tpu.memory_space<vmem>>, %arg3: memref<1x256xf32, #tpu.memory_space<vmem>>, %arg4: memref<1x256xf32, #tpu.memory_space<vmem>>, %arg5: memref<256x128xbf16, #tpu.memory_space<vmem>>, %arg6: memref<1x128xf32, #tpu.memory_space<vmem>>, %arg7: memref<1x128xf32, #tpu.memory_space<vmem>>, %arg8: memref<128x128xbf16, #tpu.memory_space<vmem>>, %arg9: memref<1x128xf32, #tpu.memory_space<vmem>>, %arg10: memref<8x128xf32, #tpu.memory_space<vmem>>, %arg11: memref<8x128xf32, #tpu.memory_space<vmem>>) attributes {dimension_semantics = [#tpu.dimension_semantics<arbitrary>], iteration_bounds = array<i64: 1>, scalar_prefetch = 0 : i64, scratch_operands = 1 : i64, tpu.core_type = #tpu.core_type<tc>, window_params = [{pipeline_mode = #tpu.pipeline_mode<synchronous>, transform_indices = @transform_0, window_bounds = array<i64: 8, 128>}, {transform_indices = @transform_1, window_bounds = array<i64: 1, 128, 256>}, {pipeline_mode = #tpu.pipeline_mode<synchronous>, transform_indices = @transform_2, window_bounds = array<i64: 1, 256>}, {pipeline_mode = #tpu.pipeline_mode<synchronous>, transform_indices = @transform_3, window_bounds = array<i64: 1, 256>}, {transform_indices = @transform_4, window_bounds = array<i64: 256, 128>}, {pipeline_mode = #tpu.pipeline_mode<synchronous>, transform_indices = @transform_5, window_bounds = array<i64: 1, 128>}, {pipeline_mode = #tpu.pipeline_mode<synchronous>, transform_indices = @transform_6, window_bounds = array<i64: 1, 128>}, {pipeline_mode = #tpu.pipeline_mode<synchronous>, transform_indices = @transform_7, window_bounds = array<i64: 128, 128>}, {pipeline_mode = #tpu.pipeline_mode<synchronous>, transform_indices = @transform_8, window_bounds = array<i64: 1, 128>}, {pipeline_mode = #tpu.pipeline_mode<synchronous>, transform_indices = @transform_9, window_bounds = array<i64: 8, 128>}]} {
    %c0 = arith.constant 0 : index
    %c0_0 = arith.constant 0 : index
    %0 = vector.load %arg1[%c0, %c0_0] : memref<8x128xbf16, #tpu.memory_space<vmem>>, vector<8x128xbf16>
    %c0_i32 = arith.constant 0 : i32
    %1 = arith.cmpi eq, %arg0, %c0_i32 : i32
    %2 = arith.extui %1 : i1 to i32
    %c0_i32_1 = arith.constant 0 : i32
    %3 = arith.cmpi ne, %2, %c0_i32_1 : i32
    scf.if %3 {
      %cst_25 = arith.constant 0.000000e+00 : f32
      %42 = vector.broadcast %cst_25 : f32 to vector<8x128xf32>
      %c0_26 = arith.constant 0 : index
      %c0_27 = arith.constant 0 : index
      %43 = vector.load %arg10[%c0_26, %c0_27] : memref<8x128xf32, #tpu.memory_space<vmem>>, vector<8x128xf32>
      tpu.vector_store %arg10[%c0_26, %c0_27], %42 {strides = array<i32>} : memref<8x128xf32, #tpu.memory_space<vmem>>, vector<8x128xf32>,
      %c0_28 = arith.constant 0 : index
      %c0_29 = arith.constant 0 : index
      %44 = vector.load %arg8[%c0_28, %c0_29] : memref<128x128xbf16, #tpu.memory_space<vmem>>, vector<128x128xbf16>
      %cst_30 = arith.constant dense<0.000000e+00> : vector<8x128xf32>
      %45 = tpu.matmul %0, %44, %cst_30 {dimension_numbers = #tpu.dot_dimension_numbers<[1], [0], [0], [1], [0, 0, 1, 1], [], []>} : vector<8x128xbf16>, vector<128x128xbf16>, vector<8x128xf32> -> vector<8x128xf32>
      %c0_31 = arith.constant 0 : index
      %c0_32 = arith.constant 0 : index
      %46 = vector.load %arg9[%c0_31, %c0_32] : memref<1x128xf32, #tpu.memory_space<vmem>>, vector<1x128xf32>
      %47 = vector.broadcast %46 : vector<1x128xf32> to vector<8x128xf32>
      %48 = arith.addf %45, %47 : vector<8x128xf32>
      %cst_33 = arith.constant 0.000000e+00 : f32
      %49 = vector.broadcast %cst_33 : f32 to vector<8x128xf32>
      %50 = arith.cmpf oge, %48, %49 : vector<8x128xf32>
      %cst_34 = arith.constant 2.000000e-01 : f32
      %51 = vector.broadcast %cst_34 : f32 to vector<8x128xf32>
      %52 = arith.mulf %51, %48 : vector<8x128xf32>
      %53 = arith.select %50, %48, %52 : vector<8x128xi1>, vector<8x128xf32>
      %c0_35 = arith.constant 0 : index
      %c0_36 = arith.constant 0 : index
      %54 = vector.load %arg11[%c0_35, %c0_36] : memref<8x128xf32, #tpu.memory_space<vmem>>, vector<8x128xf32>
      tpu.vector_store %arg11[%c0_35, %c0_36], %53 {strides = array<i32>} : memref<8x128xf32, #tpu.memory_space<vmem>>, vector<8x128xf32>,
    } else {
    }
    %c0_2 = arith.constant 0 : index
    %c0_3 = arith.constant 0 : index
    %4 = vector.load %arg3[%c0_2, %c0_3] : memref<1x256xf32, #tpu.memory_space<vmem>>, vector<1x256xf32>
    %c0_4 = arith.constant 0 : index
    %c0_5 = arith.constant 0 : index
    %5 = vector.load %arg4[%c0_4, %c0_5] : memref<1x256xf32, #tpu.memory_space<vmem>>, vector<1x256xf32>
    %c0_6 = arith.constant 0 : index
    %c0_7 = arith.constant 0 : index
    %c0_8 = arith.constant 0 : index
    %6 = vector.load %arg2[%c0_6, %c0_7, %c0_8] : memref<1x128x256xbf16, #tpu.memory_space<vmem>>, vector<1x128x256xbf16>
    %7 = vector.shape_cast %6 : vector<1x128x256xbf16> to vector<128x256xbf16>
    %cst = arith.constant dense<0.000000e+00> : vector<8x256xf32>
    %8 = tpu.matmul %0, %7, %cst {dimension_numbers = #tpu.dot_dimension_numbers<[1], [0], [0], [1], [0, 0, 1, 1], [], []>} : vector<8x128xbf16>, vector<128x256xbf16>, vector<8x256xf32> -> vector<8x256xf32>
    %cst_9 = arith.constant dense<0.000000e+00> : vector<256xf32>
    %9 = vector.multi_reduction <add>, %8, %cst_9 [0] : vector<8x256xf32> to vector<256xf32>
    %10 = vector.shape_cast %9 : vector<256xf32> to vector<1x256xf32>
    %cst_10 = arith.constant 1.250000e-01 : f32
    %11 = vector.broadcast %cst_10 : f32 to vector<1x256xf32>
    %12 = arith.mulf %10, %11 : vector<1x256xf32>
    %13 = vector.broadcast %12 : vector<1x256xf32> to vector<8x256xf32>
    %14 = arith.subf %8, %13 : vector<8x256xf32>
    %15 = arith.mulf %14, %14 : vector<8x256xf32>
    %cst_11 = arith.constant dense<0.000000e+00> : vector<256xf32>
    %16 = vector.multi_reduction <add>, %15, %cst_11 [0] : vector<8x256xf32> to vector<256xf32>
    %17 = vector.shape_cast %16 : vector<256xf32> to vector<1x256xf32>
    %cst_12 = arith.constant 1.250000e-01 : f32
    %18 = vector.broadcast %cst_12 : f32 to vector<1x256xf32>
    %19 = arith.mulf %17, %18 : vector<1x256xf32>
    %cst_13 = arith.constant 9.99999974E-6 : f32
    %20 = vector.broadcast %cst_13 : f32 to vector<1x256xf32>
    %21 = arith.addf %19, %20 : vector<1x256xf32>
    %22 = math.rsqrt %21 : vector<1x256xf32>
    %23 = arith.mulf %4, %22 : vector<1x256xf32>
    %24 = vector.broadcast %23 : vector<1x256xf32> to vector<8x256xf32>
    %25 = arith.mulf %14, %24 : vector<8x256xf32>
    %26 = vector.broadcast %5 : vector<1x256xf32> to vector<8x256xf32>
    %27 = arith.addf %25, %26 : vector<8x256xf32>
    %cst_14 = arith.constant 0.000000e+00 : f32
    %28 = vector.broadcast %cst_14 : f32 to vector<8x256xf32>
    %29 = arith.cmpf oge, %27, %28 : vector<8x256xf32>
    %cst_15 = arith.constant 2.000000e-01 : f32
    %30 = vector.broadcast %cst_15 : f32 to vector<8x256xf32>
    %31 = arith.mulf %30, %27 : vector<8x256xf32>
    %32 = arith.select %29, %27, %31 : vector<8x256xi1>, vector<8x256xf32>
    %c0_16 = arith.constant 0 : index
    %c0_17 = arith.constant 0 : index
    %33 = vector.load %arg10[%c0_16, %c0_17] : memref<8x128xf32, #tpu.memory_space<vmem>>, vector<8x128xf32>
    %34 = arith.truncf %32 : vector<8x256xf32> to vector<8x256xbf16>
    %c0_18 = arith.constant 0 : index
    %c0_19 = arith.constant 0 : index
    %35 = vector.load %arg5[%c0_18, %c0_19] : memref<256x128xbf16, #tpu.memory_space<vmem>>, vector<256x128xbf16>
    %cst_20 = arith.constant dense<0.000000e+00> : vector<8x128xf32>
    %36 = tpu.matmul %34, %35, %cst_20 {dimension_numbers = #tpu.dot_dimension_numbers<[1], [0], [0], [1], [0, 0, 1, 1], [], []>} : vector<8x256xbf16>, vector<256x128xbf16>, vector<8x128xf32> -> vector<8x128xf32>
    %37 = arith.addf %33, %36 : vector<8x128xf32>
    %c0_21 = arith.constant 0 : index
    %c0_22 = arith.constant 0 : index
    %38 = vector.load %arg10[%c0_21, %c0_22] : memref<8x128xf32, #tpu.memory_space<vmem>>, vector<8x128xf32>
    tpu.vector_store %arg10[%c0_21, %c0_22], %37 {strides = array<i32>} : memref<8x128xf32, #tpu.memory_space<vmem>>, vector<8x128xf32>,
    %c0_i32_23 = arith.constant 0 : i32
    %39 = arith.cmpi eq, %arg0, %c0_i32_23 : i32
    %40 = arith.extui %39 : i1 to i32
    %c0_i32_24 = arith.constant 0 : i32
    %41 = arith.cmpi ne, %40, %c0_i32_24 : i32
    scf.if %41 {
      %c0_25 = arith.constant 0 : index
      %c0_26 = arith.constant 0 : index
      %42 = vector.load %arg10[%c0_25, %c0_26] : memref<8x128xf32, #tpu.memory_space<vmem>>, vector<8x128xf32>
      %c0_27 = arith.constant 0 : index
      %c0_28 = arith.constant 0 : index
      %43 = vector.load %arg6[%c0_27, %c0_28] : memref<1x128xf32, #tpu.memory_space<vmem>>, vector<1x128xf32>
      %c0_29 = arith.constant 0 : index
      %c0_30 = arith.constant 0 : index
      %44 = vector.load %arg7[%c0_29, %c0_30] : memref<1x128xf32, #tpu.memory_space<vmem>>, vector<1x128xf32>
      %cst_31 = arith.constant dense<0.000000e+00> : vector<128xf32>
      %45 = vector.multi_reduction <add>, %42, %cst_31 [0] : vector<8x128xf32> to vector<128xf32>
      %46 = vector.shape_cast %45 : vector<128xf32> to vector<1x128xf32>
      %cst_32 = arith.constant 1.250000e-01 : f32
      %47 = vector.broadcast %cst_32 : f32 to vector<1x128xf32>
      %48 = arith.mulf %46, %47 : vector<1x128xf32>
      %49 = vector.broadcast %48 : vector<1x128xf32> to vector<8x128xf32>
      %50 = arith.subf %42, %49 : vector<8x128xf32>
      %51 = arith.mulf %50, %50 : vector<8x128xf32>
      %cst_33 = arith.constant dense<0.000000e+00> : vector<128xf32>
      %52 = vector.multi_reduction <add>, %51, %cst_33 [0] : vector<8x128xf32> to vector<128xf32>
      %53 = vector.shape_cast %52 : vector<128xf32> to vector<1x128xf32>
      %cst_34 = arith.constant 1.250000e-01 : f32
      %54 = vector.broadcast %cst_34 : f32 to vector<1x128xf32>
      %55 = arith.mulf %53, %54 : vector<1x128xf32>
      %cst_35 = arith.constant 9.99999974E-6 : f32
      %56 = vector.broadcast %cst_35 : f32 to vector<1x128xf32>
      %57 = arith.addf %55, %56 : vector<1x128xf32>
      %58 = math.rsqrt %57 : vector<1x128xf32>
      %59 = arith.mulf %43, %58 : vector<1x128xf32>
      %60 = vector.broadcast %59 : vector<1x128xf32> to vector<8x128xf32>
      %61 = arith.mulf %50, %60 : vector<8x128xf32>
      %62 = vector.broadcast %44 : vector<1x128xf32> to vector<8x128xf32>
      %63 = arith.addf %61, %62 : vector<8x128xf32>
      %c0_36 = arith.constant 0 : index
      %c0_37 = arith.constant 0 : index
      %64 = vector.load %arg11[%c0_36, %c0_37] : memref<8x128xf32, #tpu.memory_space<vmem>>, vector<8x128xf32>
      %65 = arith.addf %64, %63 : vector<8x128xf32>
      %cst_38 = arith.constant 0.000000e+00 : f32
      %66 = vector.broadcast %cst_38 : f32 to vector<8x128xf32>
      %67 = arith.cmpf oge, %65, %66 : vector<8x128xf32>
      %cst_39 = arith.constant 2.000000e-01 : f32
      %68 = vector.broadcast %cst_39 : f32 to vector<8x128xf32>
      %69 = arith.mulf %68, %65 : vector<8x128xf32>
      %70 = arith.select %67, %65, %69 : vector<8x128xi1>, vector<8x128xf32>
      %c0_40 = arith.constant 0 : index
      %c0_41 = arith.constant 0 : index
      %71 = vector.load %arg10[%c0_40, %c0_41] : memref<8x128xf32, #tpu.memory_space<vmem>>, vector<8x128xf32>
      tpu.vector_store %arg10[%c0_40, %c0_41], %70 {strides = array<i32>} : memref<8x128xf32, #tpu.memory_space<vmem>>, vector<8x128xf32>,
    } else {
    }
    return
  }
  func.func @transform_0(%arg0: i32) -> (i32, i32) {
    %c0_i32 = arith.constant 0 : i32
    %c0_i32_0 = arith.constant 0 : i32
    %c0_i32_1 = arith.constant 0 : i32
    return %c0_i32, %c0_i32_0 : i32, i32
  }
  func.func @transform_1(%arg0: i32) -> (i32, i32, i32) {
    %c0_i32 = arith.constant 0 : i32
    %c0_i32_0 = arith.constant 0 : i32
    %c0_i32_1 = arith.constant 0 : i32
    return %arg0, %c0_i32, %c0_i32_0 : i32, i32, i32
  }
  func.func @transform_2(%arg0: i32) -> (i32, i32) {
    %c0_i32 = arith.constant 0 : i32
    %c0_i32_0 = arith.constant 0 : i32
    %c0_i32_1 = arith.constant 0 : i32
    return %c0_i32, %c0_i32_0 : i32, i32
  }
  func.func @transform_3(%arg0: i32) -> (i32, i32) {
    %c0_i32 = arith.constant 0 : i32
    %c0_i32_0 = arith.constant 0 : i32
    %c0_i32_1 = arith.constant 0 : i32
    return %c0_i32, %c0_i32_0 : i32, i32
  }
  func.func @transform_4(%arg0: i32) -> (i32, i32) {
    %c0_i32 = arith.constant 0 : i32
    %c0_i32_0 = arith.constant 0 : i32
    return %arg0, %c0_i32 : i32, i32
  }
  func.func @transform_5(%arg0: i32) -> (i32, i32) {
    %c0_i32 = arith.constant 0 : i32
    %c0_i32_0 = arith.constant 0 : i32
    %c0_i32_1 = arith.constant 0 : i32
    return %c0_i32, %c0_i32_0 : i32, i32
  }
  func.func @transform_6(%arg0: i32) -> (i32, i32) {
    %c0_i32 = arith.constant 0 : i32
    %c0_i32_0 = arith.constant 0 : i32
    %c0_i32_1 = arith.constant 0 : i32
    return %c0_i32, %c0_i32_0 : i32, i32
  }
  func.func @transform_7(%arg0: i32) -> (i32, i32) {
    %c0_i32 = arith.constant 0 : i32
    %c0_i32_0 = arith.constant 0 : i32
    %c0_i32_1 = arith.constant 0 : i32
    return %c0_i32, %c0_i32_0 : i32, i32
  }
  func.func @transform_8(%arg0: i32) -> (i32, i32) {
    %c0_i32 = arith.constant 0 : i32
    %c0_i32_0 = arith.constant 0 : i32
    %c0_i32_1 = arith.constant 0 : i32
    return %c0_i32, %c0_i32_0 : i32, i32
  }
  func.func @transform_9(%arg0: i32) -> (i32, i32) {
    %c0_i32 = arith.constant 0 : i32
    %c0_i32_0 = arith.constant 0 : i32
    %c0_i32_1 = arith.constant 0 : i32
    return %c0_i32, %c0_i32_0 : i32, i32
  }
}

</mosaic_0001>

<bundles_post_ra>
// kernel: tpu_custom_call.1
= control target key start
LH: loop header
LB: loop body
LE: loop exit
PB: predicated region body
PF: predicated region fallthrough
CT: control target
= control target key end

     0   :  { %14 = vsyncpa [#allocation4], 0  ;;  %s1100_s0 = inlined_call_operand.hbm [shape: bf16[8,128], index: 0, kind: input, shape index: {}]   ;;  %s1101_s1 = inlined_call_operand.hbm [shape: bf16[1,128,256], index: 1, kind: input, shape index: {}]   ;;  %s1102_s2 = inlined_call_operand.hbm [shape: f32[1,256], index: 2, kind: input, shape index: {}]   ;;  %s1103_s3 = inlined_call_operand.vmem [shape: f32[1,256], index: 3, kind: input, shape index: {}]   ;;  %s1104_s4 = inlined_call_operand.hbm [shape: bf16[256,128], index: 4, kind: input, shape index: {}]   ;;  %s1105_s5 = inlined_call_operand.vmem [shape: f32[1,128], index: 5, kind: input, shape index: {}]   ;;  %s1106_s6 = inlined_call_operand.vmem [shape: f32[1,128], index: 6, kind: input, shape index: {}]   ;;  %s1107_s7 = inlined_call_operand.hbm [shape: bf16[128,128], index: 7, kind: input, shape index: {}]   ;;  %s1108_s8 = inlined_call_operand.vmem [shape: f32[1,128], index: 8, kind: input, shape index: {}]   ;;  %s1109_s9 = inlined_call_operand.hbm [shape: f32[8,128], index: 9, kind: output, shape index: {}]  }
   0x1   :  { %15 = vsyncpa [#allocation7], 0 }
   0x2   :  { %16 = vsyncpa [#allocation10], 0  ;;  %s33_s11 = sshll.u32 %s1101_s1, 4  ;;  %s34_s11 = int_to_ptr.hbm [resolvable:$true] %s33_s11 }
   0x3   :  { %17 = vsyncpa [#allocation5], 0  ;;  %s1000_s12 = smov [#allocation6]   ;;  %s59_s16 = sshll.u32 %s1104_s4, 4  ;;  %s60_s16 = int_to_ptr.hbm [resolvable:$true] %s59_s16 }
   0x4   :  { %s35_s13 = sshll.u32 %s1000_s12, 4  ;;  %s1001_s17 = smov 128   ;;  %s36_s13 = int_to_ptr.vmem [resolvable:$true] %s35_s13 }
   0x5   :  { %s1002_s18 = smov 8   ;;  %s1003_s19 = smov [#allocation9]  }
   0x6   :  { %41 = dma.hbm_to_vmem [thread:$0]  %s34_s11, 2048, %s36_s13, [#allocation7], %s1001_s17, %s1001_s17, %s1002_s18  }
   0x7   :  { %s61_s20 = sshll.u32 %s1003_s19, 4  ;;  %s1004_s21 = smov 64   ;;  %s62_s20 = int_to_ptr.vmem [resolvable:$true] %s61_s20 }
   0x8   :  { %s1005_s22 = smov 4   ;;  %s23_s24 = sshll.u32 %s1100_s0, 4  ;;  %s24_s24 = int_to_ptr.hbm [resolvable:$true] %s23_s24 }
   0x9   :  { %67 = dma.hbm_to_vmem [thread:$0]  %s60_s16, 2048, %s62_s20, [#allocation10], %s1004_s21, %s1004_s21, %s1005_s22  }
   0xa   :  { %s1006_s25 = smov [#allocation3]   ;;  %s47_s28 = sshll.u32 %s1102_s2, 4  ;;  %s48_s28 = int_to_ptr.hbm [resolvable:$true] %s47_s28 }
   0xb   :  { %s25_s26 = sshll.u32 %s1006_s25, 4  ;;  %s1007_s29 = smov [#allocation8]   ;;  %s26_s26 = int_to_ptr.vmem [resolvable:$true] %s25_s26 }
   0xc   :  { %28 = dma.hbm_to_vmem [thread:$0]  %s24_s24, 64, %s26_s26, [#allocation4]  }
   0xd   :  { %s49_s30 = sshll.u32 %s1007_s29, 4  ;;  %s76_s12 = sshll.u32 %s1107_s7, 4  ;;  %s50_s30 = int_to_ptr.vmem [resolvable:$true] %s49_s30  ;;  %s77_s12 = int_to_ptr.hbm [resolvable:$true] %s76_s12 }
   0xe   :  { %52 = dma.hbm_to_vmem [thread:$0]  %s48_s28, 32, %s50_s30, [#allocation7]  }
   0xf   :  { %s1008_s0 = smov [#allocation11]  }
  0x10   :  { %s78_s13 = sshll.u32 %s1008_s0, 4  ;;  %s79_s13 = int_to_ptr.vmem [resolvable:$true] %s78_s13 }
  0x11   :  { %84 = dma.hbm_to_vmem [thread:$0]  %s77_s12, 1024, %s79_s13, [#allocation10], %s1004_s21, %s1004_s21, %s1005_s22  }
  0x12   :  { %992 = dma.done.wait [#allocation4], 64  }
  0x13   :  { %993 = vsyncadd [#allocation4], 4294967232 }
  0x14   :  { %994 = dma.done.wait [#allocation7], 2080  }
  0x15   :  { %995 = vsyncadd [#allocation7], 4294965216 }
  0x16   :  { %996 = dma.done.wait [#allocation10], 3072  }
  0x17   :  { %997 = vsyncadd [#allocation10], 4294964224  ;;  %v719_v0 = vld [vmem:[#allocation6 + $0x70] sm:$0xf]  ;;  %v812_v1 = vld [vmem:[#allocation6 + $0x74] sm:$0xf0] }
  0x18   :  { %v811_v2 = vld [vmem:[#allocation6 + $0x74] sm:$0xf]  ;;  %v720_v3 = vor.u32 %v812_v1, %v719_v0  ;;  %v721_v4 = vld [vmem:[#allocation6 + $0x78] sm:$0xf0]  ;;  %v711_v5 = vld [vmem:[#allocation6 + $0x60] sm:$0xf] }
  0x19   :  { %v810_v6 = vld [vmem:[#allocation6 + $0x64] sm:$0xf0]  ;;  %v724_v7 = vor.u32 %v811_v2, %v721_v4  ;;  %v809_v8 = vld [vmem:[#allocation6 + $0x64] sm:$0xf]  ;;  %v713_v9 = vld [vmem:[#allocation6 + $0x68] sm:$0xf0] }
  0x1a   :  { %296 = vmatpush.bf16.msra.mxu1 %v720_v3  ;;  %v712_v10 = vor.u32 %v810_v6, %v711_v5  ;;  %v716_v11 = vor.u32 %v809_v8, %v713_v9  ;;  %v703_v12 = vld [vmem:[#allocation6 + $0x50] sm:$0xf]  ;;  %v808_v13 = vld [vmem:[#allocation6 + $0x54] sm:$0xf0]  ;;  %v807_v14 = vld [vmem:[#allocation6 + $0x54] sm:$0xf] }
  0x1b   :  { %309 = vmatpush.bf16.msra.mxu2 %v724_v7  ;;  %v705_v15 = vld [vmem:[#allocation6 + $0x58] sm:$0xf0]  ;;  %v704_v16 = vor.u32 %v808_v13, %v703_v12  ;;  %v695_v18 = vld [vmem:[#allocation6 + $0x40] sm:$0xf]  ;;  %v806_v19 = vld [vmem:[#allocation6 + $0x44] sm:$0xf0] }
  0x1c   :  { %v708_v17 = vor.u32 %v807_v14, %v705_v15  ;;  %v805_v20 = vld [vmem:[#allocation6 + $0x44] sm:$0xf]  ;;  %v697_v21 = vld [vmem:[#allocation6 + $0x48] sm:$0xf0]  ;;  %v696_v22 = vor.u32 %v806_v19, %v695_v18  ;;  %v687_v24 = vld [vmem:[#allocation6 + $0x30] sm:$0xf] }
  0x1d   :  { %v700_v23 = vor.u32 %v805_v20, %v697_v21  ;;  %v804_v25 = vld [vmem:[#allocation6 + $0x34] sm:$0xf0]  ;;  %v803_v26 = vld [vmem:[#allocation6 + $0x34] sm:$0xf]  ;;  %v689_v27 = vld [vmem:[#allocation6 + $0x38] sm:$0xf0] }
  0x1e   :  { %297 = vmatpush.bf16.msra.mxu1 %v712_v10  ;;  %v688_v28 = vor.u32 %v804_v25, %v687_v24  ;;  %v692_v29 = vor.u32 %v803_v26, %v689_v27  ;;  %v679_v30 = vld [vmem:[#allocation6 + $0x20] sm:$0xf]  ;;  %v802_v31 = vld [vmem:[#allocation6 + $0x24] sm:$0xf0]  ;;  %v801_v32 = vld [vmem:[#allocation6 + $0x24] sm:$0xf] }
  0x1f   :  { %310 = vmatpush.bf16.msra.mxu2 %v716_v11  ;;  %v681_v33 = vld [vmem:[#allocation6 + $0x28] sm:$0xf0]  ;;  %v680_v34 = vor.u32 %v802_v31, %v679_v30  ;;  %v671_v36 = vld [vmem:[#allocation6 + $0x10] sm:$0xf]  ;;  %v800_v37 = vld [vmem:[#allocation6 + $0x14] sm:$0xf0] }
  0x20   :  { %v684_v35 = vor.u32 %v801_v32, %v681_v33  ;;  %v799_v38 = vld [vmem:[#allocation6 + $0x14] sm:$0xf]  ;;  %v673_v39 = vld [vmem:[#allocation6 + $0x18] sm:$0xf0]  ;;  %v672_v40 = vor.u32 %v800_v37, %v671_v36  ;;  %v663_v42 = vld [vmem:[#allocation6] sm:$0xf] }
  0x21   :  { %v676_v41 = vor.u32 %v799_v38, %v673_v39  ;;  %v798_v43 = vld [vmem:[#allocation6 + $0x4] sm:$0xf0]  ;;  %v797_v44 = vld [vmem:[#allocation6 + $0x4] sm:$0xf]  ;;  %v665_v45 = vld [vmem:[#allocation6 + $0x8] sm:$0xf0] }
  0x22   :  { %298 = vmatpush.bf16.msra.mxu1 %v704_v16  ;;  %v664_v46 = vor.u32 %v798_v43, %v663_v42  ;;  %v668_v47 = vor.u32 %v797_v44, %v665_v45  ;;  %v107_v48 = vld [vmem:[#allocation3] sm:$0xf]  ;;  %v795_v50 = vld [vmem:[#allocation11 + $0x30] sm:$0xff]  ;;  %v794_v51 = vld [vmem:[#allocation11 + $0x28] sm:$0xff]  ;;  %vm379_vm5 = vcmask 1040384   ;;  %s617_s21 = sshll.u32 %s1109_s9, 4  ;;  %s618_s21 = int_to_ptr.hbm [resolvable:$true] %s617_s21 }
  0x23   :  { %311 = vmatpush.bf16.msra.mxu2 %v708_v17  ;;  %v796_v49 = vld [vmem:[#allocation11 + $0x38] sm:$0xff]  ;;  %v793_v52 = vld [vmem:[#allocation11 + $0x20] sm:$0xff]  ;;  %v791_v56 = vld [vmem:[#allocation11 + $0x10] sm:$0xff] }
  0x24   :  { %181 = vmatpush.bf16.msra.mxu0 %v796_v49  ;;  %v792_v53 = vld [vmem:[#allocation11 + $0x18] sm:$0xff]  ;;  %v790_v59 = vld [vmem:[#allocation11 + $0x8] sm:$0xff]  ;;  %v789_v2 = vld [vmem:[#allocation11] sm:$0xff] }
  0x25   :  { %v820_v4 = vld [vmem:[#allocation9 + $0x38] sm:$0xff]  ;;  %v819_v11 = vld [vmem:[#allocation9 + $0x30] sm:$0xff]  ;;  %v818_v17 = vld [vmem:[#allocation9 + $0x28] sm:$0xff] }
  0x26   :  { %299 = vmatpush.bf16.msra.mxu1 %v696_v22  ;;  %v828_v5 = vld [vmem:[#allocation9 + $0x78] sm:$0xff]  ;;  %534 = vmatpush.bf16.msra.mxu3 %v820_v4  ;;  %v827_v12 = vld [vmem:[#allocation9 + $0x70] sm:$0xff]  ;;  %v826_v18 = vld [vmem:[#allocation9 + $0x68] sm:$0xff] }
  0x27   :  { %312 = vmatpush.bf16.msra.mxu2 %v700_v23  ;;  %v817_v23 = vld [vmem:[#allocation9 + $0x20] sm:$0xff]  ;;  %v824_v30 = vld [vmem:[#allocation9 + $0x58] sm:$0xff]  ;;  %v823_v36 = vld [vmem:[#allocation9 + $0x50] sm:$0xff] }
  0x28   :  { %182 = vmatpush.bf16.msra.mxu0 %v795_v50  ;;  %v825_v24 = vld [vmem:[#allocation9 + $0x60] sm:$0xff] }
  0x29   :  { %v813_v43 = vld [vmem:[#allocation9] sm:$0xff] }
  0x2a   :  { %300 = vmatpush.bf16.msra.mxu1 %v688_v28  ;;  %535 = vmatpush.bf16.msra.mxu3 %v819_v11  ;;  %v821_v44 = vld [vmem:[#allocation9 + $0x40] sm:$0xff] }
  0x2b   :  { %313 = vmatpush.bf16.msra.mxu2 %v692_v29  ;;  %v816_v29 = vld [vmem:[#allocation9 + $0x18] sm:$0xff] }
  0x2c   :  { %183 = vmatpush.bf16.msra.mxu0 %v794_v51 }
  0x2e   :  { %301 = vmatpush.bf16.msra.mxu1 %v680_v34  ;;  %536 = vmatpush.bf16.msra.mxu3 %v818_v17 }
  0x2f   :  { %314 = vmatpush.bf16.msra.mxu2 %v684_v35  ;;  %v815_v35 = vld [vmem:[#allocation9 + $0x10] sm:$0xff] }
  0x30   :  { %184 = vmatpush.bf16.msra.mxu0 %v793_v52 }
  0x32   :  { %302 = vmatpush.bf16.msra.mxu1 %v672_v40  ;;  %537 = vmatpush.bf16.msra.mxu3 %v817_v23  ;;  %v814_v40 = vld [vmem:[#allocation9 + $0x8] sm:$0xff] }
  0x33   :  { %315 = vmatpush.bf16.msra.mxu2 %v676_v41  ;;  %v822_v41 = vld [vmem:[#allocation9 + $0x48] sm:$0xff] }
  0x34   :  { %185 = vmatpush.bf16.msra.mxu0 %v792_v53 }
  0x36   :  { %303 = vmatpush.bf16.msra.mxu1 %v664_v46  ;;  %538 = vmatpush.bf16.msra.mxu3 %v816_v29 }
  0x37   :  { %316 = vmatpush.bf16.msra.mxu2 %v668_v47 }
  0x38   :  { %186 = vmatpush.bf16.msra.mxu0 %v791_v56 }
  0x39   :  { %304 = vmatmul.bf16.vlgmr.msra.gmra.mxu1 %v107_v48 }
  0x3a   :  { %317 = vmatmul.bf16.vlgmr.msra.gmra.mxu2 %v107_v48  ;;  %539 = vmatpush.bf16.msra.mxu3 %v815_v35 }
  0x3c   :  { %187 = vmatpush.bf16.msra.mxu0 %v790_v59 }
  0x3e   :  { %540 = vmatpush.bf16.msra.mxu3 %v814_v40 }
  0x40   :  { %188 = vmatpush.bf16.msra.mxu0 %v789_v2 }
  0x42   :  { %541 = vmatpush.bf16.msra.mxu3 %v813_v43 }
  0x43   :  { %189 = vmatmul.bf16.vlgmr.msra.gmra.mxu0 %v107_v48 }
  0x44   :  { %547 = vmatpush.bf16.msrb.mxu0 %v828_v5 }
  0x48   :  { %548 = vmatpush.bf16.msrb.mxu0 %v827_v12 }
  0x4c   :  { %549 = vmatpush.bf16.msrb.mxu0 %v826_v18 }
  0x50   :  { %550 = vmatpush.bf16.msrb.mxu0 %v825_v24 }
  0x54   :  { %551 = vmatpush.bf16.msrb.mxu0 %v824_v30 }
  0x58   :  { %552 = vmatpush.bf16.msrb.mxu0 %v823_v36 }
  0x5c   :  { %553 = vmatpush.bf16.msrb.mxu0 %v822_v41 }
  0x60   :  { %554 = vmatpush.bf16.msrb.mxu0 %v821_v44  ;;  %v840_v44 = vld [vmem:[%s1108_s8] ss:$0 sm:$0xff]  ;;  %s1009_s8 = smov [#allocation12]  }
  0x61   :  { %s615_s19 = sshll.u32 %s1009_s8, 4  ;;  %s616_s19 = int_to_ptr.vmem [resolvable:$true] %s615_s19 }
  0xb6   :  { %v305_v54 = vpop.f32.mrf.mxu1 }
  0xb7   :  { %v322_v55 = vrot.slane %v305_v54, 4 }
  0xb9   :  { %v323_v57 = vadd.f32 %v322_v55, %v305_v54 }
  0xbb   :  { %v324_v58 = vrot.slane %v323_v57, 2 }
  0xbd   :  { %v325_v60 = vadd.f32 %v324_v58, %v323_v57  ;;  %v318_v61 = vpop.f32.mrf.mxu2 }
  0xbe   :  { %v328_v62 = vrot.slane %v318_v61, 4  ;;  %v307_v63 = vpop.f32.mrf.mxu1 }
  0xbf   :  { %v326_v0 = vrot.slane %v325_v60, 1  ;;  %v199_v63 = vld [vmem:[%s1103_s3] sm:$0x3] }
  0xc0   :  { %v329_v1 = vadd.f32 %v328_v62, %v318_v61  ;;  %v391_v5 = vperm.slane %v199_v63, 0  ;;  %v190_v17 = vpop.f32.mrf.mxu0 }
  0xc1   :  { %v327_v3 = vadd.f32 %v326_v0, %v325_v60  ;;  %v198_v60 = vld [vmem:[#allocation8] sm:$0x3] }
  0xc2   :  { %v330_v6 = vrot.slane %v329_v1, 2 }
  0xc3   :  { %v334_v7 = vmul.f32 0.125, %v327_v3  ;;  %v392_v3 = vperm.slane %v199_v63, 1 }
  0xc4   :  { %v331_v8 = vadd.f32 %v330_v6, %v329_v1 }
  0xc5   :  { %v1075_v9 = vsub.f32 %v305_v54, %v334_v7  ;;  %v320_v10 = vpop.f32.mrf.mxu2 }
  0xc6   :  { %v332_v13 = vrot.slane %v331_v8, 1 }
  0xc7   :  { %v338_v14 = vmul.f32 %v1075_v9, %v1075_v9 }
  0xc8   :  { %v333_v15 = vadd.f32 %v332_v13, %v331_v8  ;;  %v192_v18 = vpop.f32.mrf.mxu0 }
  0xc9   :  { %v340_v16 = vrot.slane %v338_v14, 4 }
  0xca   :  { %v335_v19 = vmul.f32 0.125, %v333_v15 }
  0xcb   :  { %v341_v20 = vadd.f32 %v340_v16, %v338_v14 }
  0xcc   :  { %v1079_v21 = vsub.f32 %v318_v61, %v335_v19 }
  0xcd   :  { %v342_v22 = vrot.slane %v341_v20, 2 }
  0xce   :  { %v339_v25 = vmul.f32 %v1079_v21, %v1079_v21 }
  0xcf   :  { %v343_v26 = vadd.f32 %v342_v22, %v341_v20 }
  0xd0   :  { %v346_v27 = vrot.slane %v339_v25, 4 }
  0xd1   :  { %v344_v28 = vrot.slane %v343_v26, 1 }
  0xd2   :  { %v347_v31 = vadd.f32 %v346_v27, %v339_v25 }
  0xd3   :  { %v345_v32 = vadd.f32 %v344_v28, %v343_v26 }
  0xd4   :  { %v348_v33 = vrot.slane %v347_v31, 2 }
  0xd5   :  { %v352_v34 = vmul.f32 0.125, %v345_v32 }
  0xd6   :  { %v349_v37 = vadd.f32 %v348_v33, %v347_v31 }
  0xd7   :  { %v354_v38 = vadd.f32 1e-05, %v352_v34 }
  0xd8   :  { %v350_v39 = vrot.slane %v349_v37, 1 }
  0xd9   :  { %842 = vrsqrt.f32 %v354_v38  ;;  %vm362_vm4 = vweird.f32 %v354_v38 }
  0xda   :  { %v351_v42 = vadd.f32 %v350_v39, %v349_v37 }
  0xdc   :  { %v353_v45 = vmul.f32 0.125, %v351_v42 }
  0xde   :  { %v355_v46 = vadd.f32 1e-05, %v353_v45 }
  0xdf   :  { %v843_v47 = vpop.eup %842 }
  0xe0   :  { %v357_v48 = vmul.f32 %v843_v47, %v354_v38  ;;  %844 = vrsqrt.f32 %v355_v46  ;;  %vm363_vm1 = vweird.f32 %v843_v47  ;;  %vm372_vm2 = vweird.f32 %v355_v46 }
  0xe1   :  { %vm364_vm6 = vmor %vm362_vm4, %vm363_vm1 }
  0xe2   :  { %v358_v49 = vmul.f32 %v843_v47, %v357_v48  ;;  %v191_v48 = vadd.f32 %v840_v44, %v190_v17 }
  0xe4   :  { %v359_v51 = vmul.f32 0.5, %v358_v49  ;;  %vm194_vm12 = vcmp.ge.f32.partialorder %v191_v48, 0.0 }
  0xe6   :  { %v845_v50 = vpop.eup %844  ;;  %v360_v54 = vsub.f32 1.5, %v359_v51 }
  0xe7   :  { %v367_v52 = vmul.f32 %v845_v50, %v355_v46  ;;  %vm373_vm0 = vweird.f32 %v845_v50  ;;  %v566_v46 = vld [vmem:[%s1105_s5] sm:$0x1] }
  0xe8   :  { %v361_v57 = vmul.f32 %v843_v47, %v360_v54  ;;  %vm374_vm3 = vmor %vm372_vm2, %vm373_vm0 }
  0xe9   :  { %v368_v53 = vmul.f32 %v845_v50, %v367_v52  ;;  %v841_v52 = vld [vmem:[%s1106_s6] ss:$0 sm:$0xff] }
  0xea   :  { %v365_v62 = vsel %vm364_vm6, %v843_v47, %v361_v57 }
  0xeb   :  { %v369_v55 = vmul.f32 0.5, %v368_v53  ;;  %v195_v53 = vmul.f32 0.2, %v191_v48 }
  0xed   :  { %v370_v56 = vsub.f32 1.5, %v369_v55 }
  0xef   :  { %v371_v58 = vmul.f32 %v845_v50, %v370_v56  ;;  %v196_v56 = vsel %vm194_vm12, %v191_v48, %v195_v53 }
  0xf1   :  { %v375_v59 = vsel %vm374_vm3, %v845_v50, %v371_v58 }
  0xf2   :  { %v378_v61 = vrot.slane %v375_v59, 7 }
  0xf4   :  { %v380_v0 = vsel %vm379_vm5, %v365_v62, %v378_v61 }
  0xf5   :  { %v382_v1 = vmul.f32 %v380_v0, %v198_v60 }
  0xf7   :  { %v385_v2 = vperm.slane %v382_v1, 1  ;;  %v384_v4 = vperm.slane %v382_v1, 0 }
  0xf9   :  { %v389_v6 = vmul.f32 %v385_v2, %v1079_v21  ;;  %v388_v7 = vmul.f32 %v384_v4, %v1075_v9 }
  0xfb   :  { %v396_v8 = vadd.f32 %v392_v3, %v389_v6  ;;  %v395_v10 = vadd.f32 %v391_v5, %v388_v7 }
  0xfd   :  { %vm397_vm7 = vcmp.ge.f32.partialorder %v395_v10, 0.0  ;;  %v399_v11 = vmul.f32 0.2, %v395_v10  ;;  %vm398_vm8 = vcmp.ge.f32.partialorder %v396_v8, 0.0  ;;  %v400_v12 = vmul.f32 0.2, %v396_v8 }
  0xff   :  { %v401_v13 = vsel %vm397_vm7, %v395_v10, %v399_v11  ;;  %v402_v14 = vsel %vm398_vm8, %v396_v8, %v400_v12 }
 0x100   :  { %v404_v15 = vpack.c.bf16 %v401_v13, %v401_v13  ;;  %v405_v16 = vpack.c.bf16 %v402_v14, %v402_v14 }
 0x102   :  { %542 = vmatmul.bf16.vlgmr.msra.gmra.mxu3 %v404_v15  ;;  %555 = vmatmul.bf16.vlgmr.msrb.gmra.mxu0 %v405_v16 }
 0x17f   :  { %v556_v19 = vpop.f32.mrf.mxu0 }
 0x185   :  { %v543_v20 = vpop.f32.mrf.mxu3 }
 0x186   :  { %v557_v22 = vadd.f32 %v556_v19, %v543_v20 }
 0x187   :  { %v558_v21 = vpop.f32.mrf.mxu0 }
 0x188   :  { %v568_v23 = vrot.slane %v557_v22, 4 }
 0x18a   :  { %v569_v9 = vadd.f32 %v568_v23, %v557_v22 }
 0x18c   :  { %v570_v25 = vrot.slane %v569_v9, 2 }
 0x18d   :  { %v545_v24 = vpop.f32.mrf.mxu3 }
 0x18e   :  { %v571_v26 = vadd.f32 %v570_v25, %v569_v9 }
 0x190   :  { %v572_v27 = vrot.slane %v571_v26, 1 }
 0x192   :  { %v573_v28 = vadd.f32 %v572_v27, %v571_v26 }
 0x194   :  { %v574_v29 = vmul.f32 0.125, %v573_v28 }
 0x196   :  { %v575_v30 = vsub.f32 %v557_v22, %v574_v29 }
 0x198   :  { %v576_v31 = vmul.f32 %v575_v30, %v575_v30 }
 0x19a   :  { %v577_v32 = vrot.slane %v576_v31, 4 }
 0x19c   :  { %v578_v33 = vadd.f32 %v577_v32, %v576_v31 }
 0x19e   :  { %v579_v34 = vrot.slane %v578_v33, 2 }
 0x1a0   :  { %v580_v35 = vadd.f32 %v579_v34, %v578_v33 }
 0x1a2   :  { %v581_v36 = vrot.slane %v580_v35, 1 }
 0x1a4   :  { %v582_v37 = vadd.f32 %v581_v36, %v580_v35 }
 0x1a6   :  { %v583_v38 = vmul.f32 0.125, %v582_v37 }
 0x1a8   :  { %v584_v39 = vadd.f32 1e-05, %v583_v38 }
 0x1aa   :  { %846 = vrsqrt.f32 %v584_v39  ;;  %vm591_vm10 = vweird.f32 %v584_v39 }
 0x1b0   :  { %v847_v40 = vpop.eup %846 }
 0x1b1   :  { %v586_v41 = vmul.f32 %v847_v40, %v584_v39  ;;  %vm592_vm9 = vweird.f32 %v847_v40 }
 0x1b2   :  { %vm593_vm11 = vmor %vm591_vm10, %vm592_vm9 }
 0x1b3   :  { %v587_v42 = vmul.f32 %v847_v40, %v586_v41 }
 0x1b5   :  { %v588_v43 = vmul.f32 0.5, %v587_v42 }
 0x1b7   :  { %v589_v45 = vsub.f32 1.5, %v588_v43 }
 0x1b9   :  { %v590_v47 = vmul.f32 %v847_v40, %v589_v45 }
 0x1bb   :  { %v594_v49 = vsel %vm593_vm11, %v847_v40, %v590_v47 }
 0x1bc   :  { %v595_v50 = vmul.f32 %v594_v49, %v566_v46 }
 0x1be   :  { %v597_v51 = vperm.slane %v595_v50, 0 }
 0x1c0   :  { %v599_v54 = vmul.f32 %v597_v51, %v575_v30 }
 0x1c2   :  { %v603_v55 = vadd.f32 %v841_v52, %v599_v54 }
 0x1c4   :  { %v605_v57 = vadd.f32 %v603_v55, %v196_v56 }
 0x1c6   :  { %vm606_vm13 = vcmp.ge.f32.partialorder %v605_v57, 0.0  ;;  %v607_v58 = vmul.f32 0.2, %v605_v57 }
 0x1c8   :  { %v608_v59 = vsel %vm606_vm13, %v605_v57, %v607_v58 }
 0x1c9   :  { %609 = vst [vmem:[#allocation12] sm:$0xff] %v608_v59 }
 0x1ca   :  { %620 = dma.vmem_to_hbm [thread:$0]  %s616_s19, 128, %s618_s21, [#allocation5]  }
 0x1cb   :  { %998 = dma.done.wait [#allocation5], 128  }
 0x1cc   :  { %999 = vsyncadd [#allocation5], 4294967168 }
 0x1cd   :  { %625 = vsyncpa [#allocation4], 1 }
 0x1ce   :  { %626 = vsyncpa [#allocation7], 1 }
 0x1cf   :  { %627 = vsyncpa [#allocation10], 1 }
 0x1d0   :  { %628 = vsyncpa [#allocation5], 1 }

</bundles_post_ra>
